<compile_context>
chip_gen: v6e
topology: v6e:2x2x1
jax: 0.10.0
libtpu: 0.0.40
codegen_flags: <defaults>
</compile_context>

<pallas_src>
import jax
import jax.numpy as jnp
from jax import lax
from jax.experimental import pallas as pl
from jax.experimental.pallas import tpu as pltpu

# ----------------------------- model dims -----------------------------------
N, C_IN, H, W = 2, 4, 16, 16     # input  [N, C, H, W]  (NCHW, PyTorch convention)
C_MID = 32                       # conv output channels
NUM_CLASSES = 64                 # timm num_classes=64
K = 3                            # 3x3 conv, stride 1, pad 1 ("same")
HW = H * W                       # 256 spatial positions
PATCH = K * K * C_IN             # 36  im2col row width
PATCH_PAD = 128                  # contraction dim padded to a full lane tile
CLS_PAD = 128                    # class dim padded to a full lane tile


# ----------------------------- Pallas kernel ---------------------------------
def hero_kernel(p_ref, pool_ref, w1_ref, b1_ref, w2_ref, b2_ref, o_ref):
    # p_ref   : (N*HW, PATCH_PAD)  bf16 zero-padded im2col patches, batch fused
    # pool_ref: (N, N*HW)          f32 constant block-averaging matrix (GAP)
    # w1_ref  : (PATCH_PAD, C_MID) bf16 conv weights in im2col layout, zero-pad rows
    # b1_ref  : (1, C_MID)         f32
    # w2_ref  : (C_MID, CLS_PAD)   bf16 classifier weights, zero-padded class cols
    # b2_ref  : (1, CLS_PAD)       f32; padded class columns hold -1e30
    # o_ref   : (N, CLS_PAD)       f32 softmax probabilities (lane-dense store)

    # Conv as one fused-batch bf16 MXU matmul (+ f32 bias + ReLU on the VPU).
    feat = jnp.dot(p_ref[...], w1_ref[...],
                   preferred_element_type=jnp.float32)            # [N*HW, C_MID]
    feat = jnp.maximum(feat + b1_ref[...], 0.0)

    # Global average pool per image as a matmul with the precomputed constant
    # pooling matrix (rides the MXU instead of a 256-sublane XLU reduction).
    pooled = jnp.dot(pool_ref[...], feat,
                     preferred_element_type=jnp.float32)          # [N, C_MID]

    # Classifier head (bf16 MXU, f32 accumulate). GUARD: the -1e30 bias on
    # padded class columns relies on f32 exp() underflowing to exactly 0; if
    # logits/bias ever move to bf16, mask the padded lanes explicitly instead.
    logits = jnp.dot(pooled.astype(jnp.bfloat16), w2_ref[...],
                     preferred_element_type=jnp.float32) + b2_ref[...]  # [N, CLS_PAD]

    # Softmax over the (lane-dense, 128-wide) class dim; exact division.
    m = jnp.max(logits, axis=-1, keepdims=True)
    e = jnp.exp(logits - m)
    o_ref[...] = e / jnp.sum(e, axis=-1, keepdims=True)


# ----------------------------- glue helpers -----------------------------------
def _extract_patches(x_nchw):
    """im2col via one conv HLO (no 9-slice/concat chain, no 9x HBM round trip).

    Output rows are (n, h, w), columns are the 36 patch features in the
    ordering produced by conv_general_dilated_patches; the synthetic conv
    weight w1 is stored directly in that same im2col layout.
    """
    p = lax.conv_general_dilated_patches(
        x_nchw, filter_shape=(K, K), window_strides=(1, 1),
        padding=((1, 1), (1, 1)))                                  # [N, PATCH, H, W]
    return jnp.transpose(p, (0, 2, 3, 1)).reshape(-1, PATCH)       # [N*HW, PATCH]


def prepare_params(w1, b1, w2, b2):
    """One-time parameter preparation (done at model init, not per forward)."""
    w1p = jnp.pad(w1, ((0, PATCH_PAD - PATCH), (0, 0))).astype(jnp.bfloat16)
    w2p = jnp.pad(w2, ((0, 0), (0, CLS_PAD - NUM_CLASSES))).astype(jnp.bfloat16)
    # Padded class columns carry a -1e30 f32 logit bias -> softmax prob exactly 0.
    b2p = jnp.pad(b2, ((0, 0), (0, CLS_PAD - NUM_CLASSES)),
                  constant_values=-1e30)
    # Constant block-averaging matrix: row i has 1/HW over columns [i*HW, (i+1)*HW).
    pool = jnp.repeat(jnp.eye(N, dtype=jnp.float32), HW, axis=1) / HW  # [N, N*HW]
    return pool, w1p, b1.astype(jnp.float32), w2p, b2p


_COST = pl.CostEstimate(
    flops=2 * (N * HW * PATCH_PAD * C_MID      # conv matmul
               + N * N * HW * C_MID            # pooling matmul
               + N * C_MID * CLS_PAD),         # classifier head
    transcendentals=N * CLS_PAD,               # softmax exp
    bytes_accessed=(N * HW * PATCH_PAD * 2 + PATCH_PAD * C_MID * 2
                    + C_MID * CLS_PAD * 2 + N * N * HW * 4
                    + C_MID * 4 + CLS_PAD * 4 + N * CLS_PAD * 4))


# ----------------------------- wrapper ---------------------------------------
def hero_forward(x_nchw, pool, w1p, b1, w2p, b2p):
    """x_nchw: [N, C, H, W] float32 -> [N, NUM_CLASSES] softmax probs."""
    n, c, h, w = x_nchw.shape
    assert (c, h, w) == (C_IN, H, W)

    patches = _extract_patches(x_nchw)                                 # [N*HW, 36]
    patches = jnp.pad(patches, ((0, 0), (0, PATCH_PAD - PATCH)))       # -> 128 lanes
    patches = patches.astype(jnp.bfloat16)                             # halve DMA

    out = pl.pallas_call(
        hero_kernel,
        out_shape=jax.ShapeDtypeStruct((n, CLS_PAD), jnp.float32),
        in_specs=[pl.BlockSpec(memory_space=pltpu.MemorySpace.VMEM)] * 6,
        out_specs=pl.BlockSpec(memory_space=pltpu.MemorySpace.VMEM),
        cost_estimate=_COST,
    )(patches, pool, w1p, b1, w2p, b2p)

    return out[:, :NUM_CLASSES]


# ----------------------------- reference (pure JAX, f32) ----------------------
def hero_reference(x_nchw, w1, b1, w2, b2):
    patches = _extract_patches(x_nchw).reshape(x_nchw.shape[0], HW, PATCH)
    feat = jnp.maximum(jnp.einsum("nsp,pm->nsm", patches, w1) + b1, 0.0)
    pooled = jnp.mean(feat, axis=1)
    logits = pooled @ w2 + b2[0]
    return jax.nn.softmax(logits, axis=1)


# ----------------------------- main -------------------------------------------
if __name__ == "__main__":
    key = jax.random.PRNGKey(0)
    kx_, k1, kb1, k2, kb2 = jax.random.split(key, 5)

    # Deterministic example input (NCHW, matching PyTorch conv convention).
    x = jax.random.normal(kx_, (N, C_IN, H, W), dtype=jnp.float32)

    # Deterministic synthetic backbone parameters. The conv weight is stored
    # directly in im2col layout [PATCH, C_MID] matching _extract_patches.
    w1 = jax.random.normal(k1, (PATCH, C_MID), dtype=jnp.float32) * 0.1
    b1 = jax.random.normal(kb1, (1, C_MID), dtype=jnp.float32) * 0.01
    w2 = jax.random.normal(k2, (C_MID, NUM_CLASSES), dtype=jnp.float32) * 0.1
    b2 = jax.random.normal(kb2, (1, NUM_CLASSES), dtype=jnp.float32) * 0.01

    # One-time init: padding / bf16 cast / constant pooling matrix.
    pool, w1p, b1f, w2p, b2p = prepare_params(w1, b1, w2, b2)

    fwd = jax.jit(hero_forward)
    out = jax.block_until_ready(fwd(x, pool, w1p, b1f, w2p, b2p))

    ref = hero_reference(x, w1, b1, w2, b2)
    assert out.shape == (N, NUM_CLASSES)
    # Exact softmax division -> rows sum to 1 within f32 rounding.
    assert jnp.allclose(jnp.sum(out, axis=1), 1.0, atol=1e-5)
    # Tolerance covers the bf16 MXU inputs (f32 accumulation).
    assert jnp.allclose(out, ref, atol=2e-3, rtol=2e-2)

    print("KERNEL_OK")
</pallas_src>

<mosaic_0001>
module attributes {stable_mosaic.version = 11 : i64} {
  func.func @hero_kernel(%arg0: memref<512x128xbf16, #tpu.memory_space<vmem>>, %arg1: memref<2x512xf32, #tpu.memory_space<vmem>>, %arg2: memref<128x32xbf16, #tpu.memory_space<vmem>>, %arg3: memref<1x32xf32, #tpu.memory_space<vmem>>, %arg4: memref<32x128xbf16, #tpu.memory_space<vmem>>, %arg5: memref<1x128xf32, #tpu.memory_space<vmem>>, %arg6: memref<2x128xf32, #tpu.memory_space<vmem>>) attributes {dimension_semantics = [], scalar_prefetch = 0 : i64, scratch_operands = 0 : i64, tpu.core_type = #tpu.core_type<tc>} {
    %c0 = arith.constant 0 : index
    %c0_0 = arith.constant 0 : index
    %0 = vector.load %arg0[%c0, %c0_0] : memref<512x128xbf16, #tpu.memory_space<vmem>>, vector<512x128xbf16>
    %c0_1 = arith.constant 0 : index
    %c0_2 = arith.constant 0 : index
    %1 = vector.load %arg2[%c0_1, %c0_2] : memref<128x32xbf16, #tpu.memory_space<vmem>>, vector<128x32xbf16>
    %cst = arith.constant dense<0.000000e+00> : vector<512x32xf32>
    %2 = tpu.matmul %0, %1, %cst {dimension_numbers = #tpu.dot_dimension_numbers<[1], [0], [0], [1], [0, 0, 1, 1], [], []>} : vector<512x128xbf16>, vector<128x32xbf16>, vector<512x32xf32> -> vector<512x32xf32>
    %c0_3 = arith.constant 0 : index
    %c0_4 = arith.constant 0 : index
    %3 = vector.load %arg3[%c0_3, %c0_4] : memref<1x32xf32, #tpu.memory_space<vmem>>, vector<1x32xf32>
    %4 = vector.broadcast %3 : vector<1x32xf32> to vector<512x32xf32>
    %5 = arith.addf %2, %4 : vector<512x32xf32>
    %cst_5 = arith.constant 0.000000e+00 : f32
    %6 = vector.broadcast %cst_5 : f32 to vector<512x32xf32>
    %7 = arith.maximumf %5, %6 : vector<512x32xf32>
    %c0_6 = arith.constant 0 : index
    %c0_7 = arith.constant 0 : index
    %8 = vector.load %arg1[%c0_6, %c0_7] : memref<2x512xf32, #tpu.memory_space<vmem>>, vector<2x512xf32>
    %cst_8 = arith.constant dense<0.000000e+00> : vector<2x32xf32>
    %9 = tpu.matmul %8, %7, %cst_8 {dimension_numbers = #tpu.dot_dimension_numbers<[1], [0], [0], [1], [0, 0, 1, 1], [], []>} : vector<2x512xf32>, vector<512x32xf32>, vector<2x32xf32> -> vector<2x32xf32>
    %10 = arith.truncf %9 : vector<2x32xf32> to vector<2x32xbf16>
    %c0_9 = arith.constant 0 : index
    %c0_10 = arith.constant 0 : index
    %11 = vector.load %arg4[%c0_9, %c0_10] : memref<32x128xbf16, #tpu.memory_space<vmem>>, vector<32x128xbf16>
    %cst_11 = arith.constant dense<0.000000e+00> : vector<2x128xf32>
    %12 = tpu.matmul %10, %11, %cst_11 {dimension_numbers = #tpu.dot_dimension_numbers<[1], [0], [0], [1], [0, 0, 1, 1], [], []>} : vector<2x32xbf16>, vector<32x128xbf16>, vector<2x128xf32> -> vector<2x128xf32>
    %c0_12 = arith.constant 0 : index
    %c0_13 = arith.constant 0 : index
    %13 = vector.load %arg5[%c0_12, %c0_13] : memref<1x128xf32, #tpu.memory_space<vmem>>, vector<1x128xf32>
    %14 = vector.broadcast %13 : vector<1x128xf32> to vector<2x128xf32>
    %15 = arith.addf %12, %14 : vector<2x128xf32>
    %cst_14 = arith.constant dense<0xFF800000> : vector<2xf32>
    %16 = vector.multi_reduction <maximumf>, %15, %cst_14 [1] : vector<2x128xf32> to vector<2xf32>
    %17 = vector.shape_cast %16 : vector<2xf32> to vector<2x1xf32>
    %18 = vector.broadcast %17 : vector<2x1xf32> to vector<2x128xf32>
    %19 = arith.subf %15, %18 : vector<2x128xf32>
    %20 = math.exp %19 : vector<2x128xf32>
    %cst_15 = arith.constant dense<0.000000e+00> : vector<2xf32>
    %21 = vector.multi_reduction <add>, %20, %cst_15 [1] : vector<2x128xf32> to vector<2xf32>
    %22 = vector.shape_cast %21 : vector<2xf32> to vector<2x1xf32>
    %23 = vector.broadcast %22 : vector<2x1xf32> to vector<2x128xf32>
    %24 = arith.divf %20, %23 : vector<2x128xf32>
    %c0_16 = arith.constant 0 : index
    %c0_17 = arith.constant 0 : index
    %25 = vector.load %arg6[%c0_16, %c0_17] : memref<2x128xf32, #tpu.memory_space<vmem>>, vector<2x128xf32>
    tpu.vector_store %arg6[%c0_16, %c0_17], %24 {strides = array<i32>} : memref<2x128xf32, #tpu.memory_space<vmem>>, vector<2x128xf32>,
    return
  }
}

</mosaic_0001>

<bundles_post_ra>
// kernel: hero_forward.1
= control target key start
LH: loop header
LB: loop body
LE: loop exit
PB: predicated region body
PF: predicated region fallthrough
CT: control target
= control target key end

     0   :  { %s1677_s0 = inlined_call_operand.vmem [shape: bf16[512,128], index: 0, kind: input, shape index: {}]   ;;  %s1678_s1 = inlined_call_operand.vmem [shape: f32[2,512], index: 1, kind: input, shape index: {}]   ;;  %s1679_s2 = inlined_call_operand.vmem [shape: bf16[128,32], index: 2, kind: input, shape index: {}]   ;;  %s1680_s3 = inlined_call_operand.vmem [shape: f32[1,32], index: 3, kind: input, shape index: {}]   ;;  %s1681_s4 = inlined_call_operand.vmem [shape: bf16[32,128], index: 4, kind: input, shape index: {}]   ;;  %s1682_s5 = inlined_call_operand.vmem [shape: f32[1,128], index: 5, kind: input, shape index: {}]   ;;  %s1683_s6 = inlined_call_operand.hbm [shape: f32[2,128], index: 6, kind: output, shape index: {}]  }
   0x1   :  { %v1229_v0 = vld [vmem:[%s1679_s2 + $0x38] sm:$0xff]   ;;  %v1230_v1 = vld [vmem:[%s1679_s2 + $0x30] sm:$0xff]   ;;  %v1231_v2 = vld [vmem:[%s1679_s2 + $0x28] sm:$0xff]  }
   0x2   :  { %1121 = vmatprep.subr.bf16.mxu0 %v1229_v0  ;;  %1209 = vmatprep.subr.bf16.mxu1 %v1229_v0  ;;  %v1232_v3 = vld [vmem:[%s1679_s2 + $0x20] sm:$0xff]   ;;  %v1233_v5 = vld [vmem:[%s1679_s2 + $0x18] sm:$0xff]   ;;  %v1234_v6 = vld [vmem:[%s1679_s2 + $0x10] sm:$0xff]  }
   0x3   :  { %1122 = vmatpush3.bf16.msra.mxu0 %v1229_v0  ;;  %1217 = vmatpush3.bf16.msra.mxu1 %v1229_v0  ;;  %v1237_v4 = vld [vmem:[%s1677_s0] sm:$0xff]   ;;  %v1235_v7 = vld [vmem:[%s1679_s2 + $0x8] sm:$0xff]   ;;  %v1252_v8 = vld [vmem:[%s1677_s0 + $0xb0] sm:$0xff]  }
   0x4   :  { %1123 = vmatprep.subr.bf16.mxu0 %v1230_v1  ;;  %1210 = vmatprep.subr.bf16.mxu1 %v1230_v1  ;;  %v1236_v9 = vld [vmem:[%s1679_s2] sm:$0xff]   ;;  %v1238_v10 = vld [vmem:[%s1677_s0 + $0x8] sm:$0xff]   ;;  %v1239_v11 = vld [vmem:[%s1677_s0 + $0x10] sm:$0xff]  }
   0x5   :  { %1137 = vmatprep.mubr.bf16.mxu0 %v1237_v4  ;;  %1181 = vmatprep.mubr.bf16.mxu1 %v1252_v8  ;;  %v1254_v12 = vld [vmem:[%s1677_s0 + $0xb8] sm:$0xff]   ;;  %v1255_v13 = vld [vmem:[%s1677_s0 + $0xc0] sm:$0xff]   ;;  %v1256_v16 = vld [vmem:[%s1677_s0 + $0xc8] sm:$0xff]  }
   0x6   :  { %v1240_v14 = vld [vmem:[%s1677_s0 + $0x18] sm:$0xff]   ;;  %v1241_v15 = vld [vmem:[%s1677_s0 + $0x20] sm:$0xff]   ;;  %v1257_v17 = vld [vmem:[%s1677_s0 + $0xd0] sm:$0xff]  }
   0x7   :  { %1124 = vmatpush3.bf16.msra.mxu0 %v1230_v1  ;;  %1218 = vmatpush3.bf16.msra.mxu1 %v1230_v1 }
   0x8   :  { %1125 = vmatprep.subr.bf16.mxu0 %v1231_v2  ;;  %1211 = vmatprep.subr.bf16.mxu1 %v1231_v2 }
   0xb   :  { %1126 = vmatpush3.bf16.msra.mxu0 %v1231_v2  ;;  %1219 = vmatpush3.bf16.msra.mxu1 %v1231_v2 }
   0xc   :  { %1127 = vmatprep.subr.bf16.mxu0 %v1232_v3  ;;  %1212 = vmatprep.subr.bf16.mxu1 %v1232_v3 }
   0xf   :  { %1128 = vmatpush3.bf16.msra.mxu0 %v1232_v3  ;;  %1220 = vmatpush3.bf16.msra.mxu1 %v1232_v3 }
  0x10   :  { %1129 = vmatprep.subr.bf16.mxu0 %v1233_v5  ;;  %1213 = vmatprep.subr.bf16.mxu1 %v1233_v5 }
  0x13   :  { %1130 = vmatpush3.bf16.msra.mxu0 %v1233_v5  ;;  %1221 = vmatpush3.bf16.msra.mxu1 %v1233_v5 }
  0x14   :  { %1131 = vmatprep.subr.bf16.mxu0 %v1234_v6  ;;  %1214 = vmatprep.subr.bf16.mxu1 %v1234_v6 }
  0x17   :  { %1132 = vmatpush3.bf16.msra.mxu0 %v1234_v6  ;;  %1222 = vmatpush3.bf16.msra.mxu1 %v1234_v6 }
  0x18   :  { %1133 = vmatprep.subr.bf16.mxu0 %v1235_v7  ;;  %1215 = vmatprep.subr.bf16.mxu1 %v1235_v7 }
  0x1b   :  { %1134 = vmatpush3.bf16.msra.mxu0 %v1235_v7  ;;  %1223 = vmatpush3.bf16.msra.mxu1 %v1235_v7 }
  0x1c   :  { %1135 = vmatprep.subr.bf16.mxu0 %v1236_v9  ;;  %1216 = vmatprep.subr.bf16.mxu1 %v1236_v9 }
  0x1f   :  { %1136 = vmatpush3.bf16.msra.mxu0 %v1236_v9  ;;  %1224 = vmatpush3.bf16.msra.mxu1 %v1236_v9 }
  0x22   :  { %1138 = vmatmul.mubr.bf16.vlgmr.msra.gmra.mxu0 %v1238_v10  ;;  %1182 = vmatmul.mubr.bf16.vlgmr.msra.gmra.mxu1 %v1254_v12 }
  0x23   :  { %1141 = vmatprep.mubr.bf16.mxu0 %v1239_v11  ;;  %1185 = vmatprep.mubr.bf16.mxu1 %v1255_v13 }
  0x24   :  { %11 = vsyncpa [#allocation3], 0  ;;  %v1242_v18 = vld [vmem:[%s1677_s0 + $0x28] sm:$0xff]   ;;  %v1258_v19 = vld [vmem:[%s1677_s0 + $0xd8] sm:$0xff]   ;;  %v1298_v40 = vmov 1983009808   ;;  %v711_v42 = vlaneseq }
  0x25   :  { %v1243_v20 = vld [vmem:[%s1677_s0 + $0x30] sm:$0xff]   ;;  %v1259_v21 = vld [vmem:[%s1677_s0 + $0xe0] sm:$0xff]   ;;  %v1244_v22 = vld [vmem:[%s1677_s0 + $0x38] sm:$0xff]   ;;  %v709_v41 = vunpack.c.l.s4 %v1298_v40  ;;  %vm1300_vm0 = vmmov 0   ;;  %vm892_vm1 = vcmask 261120   ;;  %vm936_vm2 = vcmask 1041408  }
  0x26   :  { %v1261_v23 = vld [vmem:[%s1677_s0 + $0xe8] sm:$0xff]   ;;  %v1245_v24 = vld [vmem:[%s1677_s0 + $0x40] sm:$0xff]   ;;  %v1263_v25 = vld [vmem:[%s1677_s0 + $0xf0] sm:$0xff]   ;;  %v712_v44 = vshrl.u32 %v711_v42, 7 }
  0x27   :  { %v1246_v26 = vld [vmem:[%s1677_s0 + $0x48] sm:$0xff]   ;;  %v1265_v27 = vld [vmem:[%s1677_s0 + $0xf8] sm:$0xff]   ;;  %v1247_v28 = vld [vmem:[%s1677_s0 + $0x50] sm:$0xff]   ;;  %v710_v43 = vunpack.c.0.s8 %v709_v41 }
  0x28   :  { %v1248_v29 = vld [vmem:[%s1677_s0 + $0x58] sm:$0xff]   ;;  %v1249_v30 = vld [vmem:[%s1677_s0 + $0x60] sm:$0xff]   ;;  %v1250_v31 = vld [vmem:[%s1677_s0 + $0x68] sm:$0xff]  }
  0x29   :  { %v1251_v32 = vld [vmem:[%s1677_s0 + $0x70] sm:$0xff]   ;;  %v1253_v33 = vld [vmem:[%s1677_s0 + $0x78] sm:$0xff]   ;;  %v1260_v34 = vld [vmem:[%s1677_s0 + $0x80] sm:$0xff]   ;;  %v713_v45 = vsub.s32 %v710_v43, %v712_v44 }
  0x2a   :  { %1142 = vmatmul.mubr.bf16.gmra.mxu0 %v1240_v14  ;;  %1186 = vmatmul.mubr.bf16.gmra.mxu1 %v1256_v16  ;;  %v1262_v35 = vld [vmem:[%s1677_s0 + $0x88] sm:$0xff]   ;;  %v1264_v36 = vld [vmem:[%s1677_s0 + $0x90] sm:$0xff]   ;;  %v1266_v37 = vld [vmem:[%s1677_s0 + $0x98] sm:$0xff]  }
  0x2b   :  { %1145 = vmatprep.mubr.bf16.mxu0 %v1241_v15  ;;  %1189 = vmatprep.mubr.bf16.mxu1 %v1257_v17  ;;  %v1267_v38 = vld [vmem:[%s1677_s0 + $0xa0] sm:$0xff]   ;;  %v1268_v39 = vld [vmem:[%s1677_s0 + $0xa8] sm:$0xff]  }
  0x2c   :  { %v705_v46 = vld [vmem:[%s1678_s1] sm:$0xff] }
  0x2d   :  { %v1460_v47 = vrot.slane %v705_v46, %v713_v45  ;;  %v707_v49 = vcombine.high %v705_v46, %v705_v46 }
  0x2f   :  { %v722_v48 = vcombine.high %v1460_v47, %v1460_v47  ;;  %v1464_v50 = vrot.slane %v707_v49, %v713_v45 }
  0x32   :  { %1146 = vmatmul.mubr.bf16.gmra.mxu0 %v1242_v18  ;;  %1190 = vmatmul.mubr.bf16.gmra.mxu1 %v1258_v19 }
  0x33   :  { %1149 = vmatprep.mubr.bf16.mxu0 %v1243_v20  ;;  %1193 = vmatprep.mubr.bf16.mxu1 %v1259_v21 }
  0x3a   :  { %1150 = vmatmul.mubr.bf16.gmra.mxu0 %v1244_v22  ;;  %1194 = vmatmul.mubr.bf16.gmra.mxu1 %v1261_v23 }
  0x3b   :  { %1153 = vmatprep.mubr.bf16.mxu0 %v1245_v24  ;;  %1197 = vmatprep.mubr.bf16.mxu1 %v1263_v25 }
  0x42   :  { %1154 = vmatmul.mubr.bf16.gmra.mxu0 %v1246_v26  ;;  %1198 = vmatmul.mubr.bf16.gmra.mxu1 %v1265_v27 }
  0x43   :  { %1157 = vmatprep.mubr.bf16.mxu0 %v1247_v28  ;;  %792 = vmatprep.mubr.f32.mxu1 %v722_v48  ;;  %v1527_v28 = vld [vmem:[%s1680_s3] ss:$0 sm:$0xff] }
  0x4a   :  { %1158 = vmatmul.mubr.bf16.gmra.mxu0 %v1248_v29 }
  0x4b   :  { %1161 = vmatprep.mubr.bf16.mxu0 %v1249_v30 }
  0x52   :  { %1162 = vmatmul.mubr.bf16.gmra.mxu0 %v1250_v31 }
  0x53   :  { %1165 = vmatprep.mubr.bf16.mxu0 %v1251_v32 }
  0x5a   :  { %1166 = vmatmul.mubr.bf16.gmra.mxu0 %v1253_v33 }
  0x5b   :  { %1169 = vmatprep.mubr.bf16.mxu0 %v1260_v34 }
  0x62   :  { %1170 = vmatmul.mubr.bf16.gmra.mxu0 %v1262_v35 }
  0x63   :  { %1173 = vmatprep.mubr.bf16.mxu0 %v1264_v36 }
  0x6a   :  { %1174 = vmatmul.mubr.bf16.gmra.mxu0 %v1266_v37 }
  0x6b   :  { %1177 = vmatprep.mubr.bf16.mxu0 %v1267_v38 }
  0x72   :  { %1178 = vmatmul.mubr.bf16.gmra.mxu0 %v1268_v39 }
  0xe2   :  { %v1466_v51 = vpop.f32.mrf.mxu0  ;;  %v1484_v60 = vpop.f32.mrf.mxu1 }
  0xe4   :  { %v1468_v52 = vpop.f32.mrf.mxu0  ;;  %v1488_v63 = vpop.f32.mrf.mxu1 }
  0xe6   :  { %v1470_v53 = vpop.f32.mrf.mxu0  ;;  %v1492_v2 = vpop.f32.mrf.mxu1 }
  0xe8   :  { %v1472_v54 = vpop.f32.mrf.mxu0  ;;  %v1494_v5 = vpop.f32.mrf.mxu1 }
  0xea   :  { %v1474_v55 = vpop.f32.mrf.mxu0  ;;  %v1498_v8 = vpop.f32.mrf.mxu1 }
  0xec   :  { %v1476_v56 = vpop.f32.mrf.mxu0  ;;  %v1504_v11 = vpop.f32.mrf.mxu1 }
  0xee   :  { %v1478_v57 = vpop.f32.mrf.mxu0  ;;  %v1510_v14 = vpop.f32.mrf.mxu1 }
  0xf0   :  { %v1480_v58 = vpop.f32.mrf.mxu0  ;;  %v1514_v17 = vpop.f32.mrf.mxu1 }
  0xf2   :  { %v1482_v59 = vpop.f32.mrf.mxu0  ;;  %v1518_v20 = vpop.f32.mrf.mxu1 }
  0xf4   :  { %v1486_v61 = vpop.f32.mrf.mxu0  ;;  %v1520_v23 = vpop.f32.mrf.mxu1 }
  0xf6   :  { %v1148_v62 = vpop.f32.mrf.mxu0  ;;  %v1522_v26 = vpop.f32.mrf.mxu1 }
  0xf8   :  { %v1490_v0 = vpop.f32.mrf.mxu0  ;;  %v1530_v31 = vpop.f32.mrf.mxu1 }
  0xfa   :  { %v1151_v1 = vpop.f32.mrf.mxu0  ;;  %v1537_v40 = vpop.f32.mrf.mxu1 }
  0xfb   :  { %v443_v34 = vadd.f32 %v1151_v1, %v1527_v28  ;;  %v430_v1 = vadd.f32 %v1148_v62, %v1527_v28 }
  0xfc   :  { %v434_v3 = vpop.f32.mrf.mxu0 }
  0xfd   :  { %v655_v44 = vmax.f32 %v443_v34, 0.0  ;;  %v435_v45 = vadd.f32 %v1527_v28, %v434_v3  ;;  %v427_v3 = vadd.f32 %v1482_v59, %v1527_v28  ;;  %v422_v34 = vadd.f32 %v1527_v28, %v1490_v0 }
  0xfe   :  { %v1152_v4 = vpop.f32.mrf.mxu0  ;;  %v414_v0 = vadd.f32 %v1478_v57, %v1527_v28 }
  0xff   :  { %v446_v29 = vadd.f32 %v1152_v4, %v1527_v28 }
 0x100   :  { %v437_v6 = vpop.f32.mrf.mxu0 }
 0x101   :  { %v656_v38 = vmax.f32 %v446_v29, 0.0  ;;  %v438_v39 = vadd.f32 %v1527_v28, %v437_v6  ;;  %v1547_v6 = vpop.f32.mrf.mxu1 }
 0x102   :  { %v1496_v7 = vpop.f32.mrf.mxu0 }
 0x103   :  { %v654_v4 = vmax.f32 %v438_v39, 0.0 }
 0x104   :  { %v1500_v9 = vpop.f32.mrf.mxu0 }
 0x106   :  { %v1502_v10 = vpop.f32.mrf.mxu0 }
 0x108   :  { %v1506_v12 = vpop.f32.mrf.mxu0 }
 0x10a   :  { %v1508_v13 = vpop.f32.mrf.mxu0 }
 0x10c   :  { %v1512_v15 = vpop.f32.mrf.mxu0 }
 0x10e   :  { %v1160_v16 = vpop.f32.mrf.mxu0 }
 0x110   :  { %v1516_v18 = vpop.f32.mrf.mxu0 }
 0x111   :  { %v470_v57 = vadd.f32 %v1527_v28, %v1516_v18  ;;  %v462_v18 = vadd.f32 %v1502_v10, %v1527_v28 }
 0x112   :  { %v1163_v19 = vpop.f32.mrf.mxu0 }
 0x113   :  { %v660_v10 = vmax.f32 %v462_v18, 0.0 }
 0x114   :  { %v482_v21 = vpop.f32.mrf.mxu0 }
 0x116   :  { %v1164_v22 = vpop.f32.mrf.mxu0 }
 0x117   :  { %v494_v48 = vadd.f32 %v1164_v22, %v1527_v28 }
 0x118   :  { %v485_v24 = vpop.f32.mrf.mxu0 }
 0x119   :  { %v486_v62 = vadd.f32 %v1527_v28, %v485_v24  ;;  %v478_v24 = vadd.f32 %v1160_v16, %v1527_v28 }
 0x11a   :  { %v1167_v25 = vpop.f32.mrf.mxu0 }
 0x11b   :  { %v507_v32 = vadd.f32 %v1167_v25, %v1527_v28  ;;  %v666_v39 = vmax.f32 %v486_v62, 0.0 }
 0x11c   :  { %v498_v27 = vpop.f32.mrf.mxu0 }
 0x11d   :  { %v671_v42 = vmax.f32 %v507_v32, 0.0  ;;  %v499_v43 = vadd.f32 %v1527_v28, %v498_v27  ;;  %v491_v27 = vadd.f32 %v1163_v19, %v1527_v28  ;;  %v668_v32 = vmax.f32 %v494_v48, 0.0 }
 0x11e   :  { %v1168_v30 = vpop.f32.mrf.mxu0  ;;  %v664_v48 = vmax.f32 %v478_v24, 0.0  ;;  %v451_v24 = vadd.f32 %v1527_v28, %v1500_v9 }
 0x11f   :  { %v510_v33 = vadd.f32 %v1168_v30, %v1527_v28  ;;  %v669_v29 = vmax.f32 %v499_v43, 0.0  ;;  %v653_v30 = vmax.f32 %v435_v45, 0.0  ;;  %v667_v19 = vmax.f32 %v491_v27, 0.0 }
 0x120   :  { %v501_v35 = vpop.f32.mrf.mxu0  ;;  %v467_v27 = vadd.f32 %v1527_v28, %v1512_v15  ;;  %v459_v15 = vadd.f32 %v1496_v7, %v1527_v28 }
 0x121   :  { %v672_v36 = vmax.f32 %v510_v33, 0.0  ;;  %v502_v37 = vadd.f32 %v1527_v28, %v501_v35  ;;  %v652_v33 = vmax.f32 %v430_v1, 0.0  ;;  %v1559_v35 = vpop.f32.mrf.mxu1  ;;  %v406_v1 = vadd.f32 %v1527_v28, %v1480_v58 }
 0x122   :  { %v1539_v41 = vpop.f32.mrf.mxu0  ;;  %v398_v58 = vadd.f32 %v1470_v53, %v1527_v28  ;;  %v622_v18 = vadd.f32 %v1559_v35, %v1527_v28 }
 0x123   :  { %1048 = vmatprep.subr.mxu1 %v672_v36  ;;  %v670_v49 = vmax.f32 %v502_v37, 0.0  ;;  %v483_v36 = vadd.f32 %v1527_v28, %v482_v21  ;;  %v651_v37 = vmax.f32 %v427_v3, 0.0  ;;  %v1569_v43 = vpop.f32.mrf.mxu1  ;;  %v475_v21 = vadd.f32 %v1508_v13, %v1527_v28 }
 0x124   :  { %1049 = vmatpush3.msra.mxu1 %v656_v38  ;;  %v1543_v46 = vpop.f32.mrf.mxu0  ;;  %v419_v38 = vadd.f32 %v1527_v28, %v1486_v61  ;;  %v411_v61 = vadd.f32 %v1474_v55, %v1527_v28  ;;  %v403_v3 = vadd.f32 %v1527_v28, %v1476_v56  ;;  %v395_v56 = vadd.f32 %v1466_v51, %v1527_v28 }
 0x125   :  { %1050 = vmatprep.subr.mxu1 %v671_v42  ;;  %v650_v42 = vmax.f32 %v422_v34, 0.0  ;;  %v1199_v13 = vpop.f32.mrf.mxu1  ;;  %v644_v53 = vmax.f32 %v398_v58, 0.0  ;;  %v614_v35 = vadd.f32 %v1527_v28, %v1569_v43 }
 0x126   :  { %1051 = vmatpush3.msra.mxu1 %v655_v44  ;;  %v1549_v25 = vpop.f32.mrf.mxu0  ;;  %v665_v44 = vmax.f32 %v483_v36, 0.0  ;;  %v649_v16 = vmax.f32 %v419_v38, 0.0  ;;  %v647_v55 = vmax.f32 %v411_v61, 0.0  ;;  %v454_v36 = vadd.f32 %v1527_v28, %v1506_v12 }
 0x127   :  { %1052 = vmatprep.subr.mxu1 %v670_v49  ;;  %v648_v49 = vmax.f32 %v414_v0, 0.0  ;;  %v626_v62 = vpop.f32.mrf.mxu1  ;;  %v659_v38 = vmax.f32 %v459_v15, 0.0  ;;  %v643_v51 = vmax.f32 %v395_v56, 0.0  ;;  %v387_v0 = vadd.f32 %v1527_v28, %v1468_v52 }
 0x128   :  { %1053 = vmatpush3.msra.mxu1 %v654_v4  ;;  %v1554_v22 = vpop.f32.mrf.mxu0  ;;  %v663_v4 = vmax.f32 %v475_v21, 0.0  ;;  %v657_v61 = vmax.f32 %v451_v24, 0.0  ;;  %v635_v9 = vadd.f32 %v1199_v13, %v1527_v28  ;;  %v571_v52 = vadd.f32 %v1484_v60, %v1527_v28 }
 0x129   :  { %1054 = vmatprep.subr.mxu1 %v669_v29  ;;  %v1200_v7 = vpop.f32.mrf.mxu1  ;;  %v603_v24 = vadd.f32 %v1518_v20, %v1527_v28  ;;  %v595_v20 = vadd.f32 %v1527_v28, %v1520_v23 }
 0x12a   :  { %1055 = vmatpush3.msra.mxu1 %v653_v30  ;;  %v1562_v59 = vpop.f32.mrf.mxu0  ;;  %v662_v30 = vmax.f32 %v470_v57, 0.0  ;;  %v638_v12 = vadd.f32 %v1200_v7, %v1527_v28  ;;  %v723_v57 = vcombine.high %v1464_v50, %v1464_v50  ;;  %v703_v13 = vmax.f32 %v635_v9, 0.0 }
 0x12b   :  { %1056 = vmatprep.subr.mxu1 %v668_v32  ;;  %v646_v32 = vmax.f32 %v406_v1, 0.0  ;;  %v698_v7 = vmax.f32 %v614_v35, 0.0  ;;  %v693_v23 = vmax.f32 %v595_v20, 0.0  ;;  %v523_v9 = vadd.f32 %v1539_v41, %v1527_v28 }
 0x12c   :  { %1057 = vmatpush3.msra.mxu1 %v652_v33  ;;  %v1573_v45 = vpop.f32.mrf.mxu0  ;;  %v661_v33 = vmax.f32 %v467_v27, 0.0  ;;  %v627_v27 = vadd.f32 %v1527_v28, %v626_v62  ;;  %v515_v41 = vadd.f32 %v1527_v28, %v1543_v46 }
 0x12d   :  { %1058 = vmatprep.subr.mxu1 %v667_v19  ;;  %v645_v19 = vmax.f32 %v403_v3, 0.0  ;;  %v563_v3 = vadd.f32 %v1527_v28, %v1488_v63 }
 0x12e   :  { %1059 = vmatpush3.msra.mxu1 %v651_v37  ;;  %v1583_v29 = vpop.f32.mrf.mxu0  ;;  %v390_v37 = vadd.f32 %v1527_v28, %v1472_v54  ;;  %v574_v54 = vadd.f32 %v1492_v2, %v1527_v28 }
 0x12f   :  { %1060 = vmatprep.subr.mxu1 %v666_v39  ;;  %v685_v15 = vmax.f32 %v563_v3, 0.0  ;;  %v542_v43 = vadd.f32 %v1583_v29, %v1527_v28 }
 0x130   :  { %1061 = vmatpush3.msra.mxu1 %v650_v42  ;;  %v1593_v34 = vpop.f32.mrf.mxu0  ;;  %v658_v42 = vmax.f32 %v454_v36, 0.0  ;;  %v642_v21 = vmax.f32 %v390_v37, 0.0  ;;  %v688_v2 = vmax.f32 %v574_v54, 0.0  ;;  %v606_v37 = vadd.f32 %v1522_v26, %v1527_v28 }
 0x131   :  { %1062 = vmatprep.subr.mxu1 %v665_v44  ;;  %v629_v44 = vpop.f32.mrf.mxu1  ;;  %v598_v26 = vadd.f32 %v1527_v28, %v1530_v31  ;;  %v534_v29 = vadd.f32 %v1527_v28, %v1593_v34  ;;  %v590_v54 = vadd.f32 %v1510_v14, %v1527_v28  ;;  %v582_v14 = vadd.f32 %v1527_v28, %v1514_v17 }
 0x132   :  { %1063 = vmatpush3.msra.mxu1 %v649_v16  ;;  %v1179_v39 = vpop.f32.mrf.mxu0  ;;  %v630_v1 = vadd.f32 %v1527_v28, %v629_v44  ;;  %v526_v44 = vadd.f32 %v1549_v25, %v1527_v28  ;;  %v518_v25 = vadd.f32 %v1527_v28, %v1554_v22  ;;  %v1299_v22 = vmov 0.0  }
 0x133   :  { %1064 = vmatprep.subr.mxu1 %v664_v48  ;;  %v641_v48 = vmax.f32 %v387_v0, 0.0  ;;  %v555_v63 = vadd.f32 %v1179_v39, %v1527_v28  ;;  %v696_v0 = vmax.f32 %v606_v37, 0.0  ;;  %v694_v31 = vmax.f32 %v598_v26, 0.0 }
 0x134   :  { %1065 = vmatpush3.msra.mxu1 %v648_v49  ;;  %v546_v16 = vpop.f32.mrf.mxu0  ;;  %v704_v49 = vmax.f32 %v638_v12, 0.0  ;;  %v695_v12 = vmax.f32 %v603_v24, 0.0  ;;  %v678_v34 = vmax.f32 %v534_v29, 0.0 }
 0x135   :  { %1066 = vmatprep.subr.mxu1 %v663_v4  ;;  %v566_v4 = vadd.f32 %v1527_v28, %v1494_v5  ;;  %v683_v36 = vmax.f32 %v555_v63, 0.0 }
 0x136   :  { %1067 = vmatpush3.msra.mxu1 %v647_v55  ;;  %v1180_v60 = vpop.f32.mrf.mxu0  ;;  %v687_v55 = vmax.f32 %v571_v52, 0.0 }
 0x137   :  { %1068 = vmatprep.subr.mxu1 %v662_v30  ;;  %v702_v30 = vmax.f32 %v630_v1, 0.0  ;;  %v686_v5 = vmax.f32 %v566_v4, 0.0  ;;  %v558_v58 = vadd.f32 %v1180_v60, %v1527_v28  ;;  %v674_v1 = vmax.f32 %v518_v25, 0.0 }
 0x138   :  { %1069 = vmatpush3.msra.mxu1 %v646_v32  ;;  %v619_v32 = vadd.f32 %v1537_v40, %v1527_v28  ;;  %v549_v62 = vpop.f32.mrf.mxu0  ;;  %v611_v40 = vadd.f32 %v1527_v28, %v1547_v6  ;;  %v539_v6 = vadd.f32 %v1562_v59, %v1527_v28  ;;  %v531_v59 = vadd.f32 %v1527_v28, %v1573_v45 }
 0x139   :  { %1070 = vmatprep.subr.mxu1 %v661_v33  ;;  %v700_v33 = vmax.f32 %v622_v18, 0.0  ;;  %v684_v56 = vmax.f32 %v558_v58, 0.0  ;;  %v1004_v18 = vld [vmem:[%s1682_s5] ss:$0 sm:$0xff] }
 0x13a   :  { %1071 = vmatpush3.msra.mxu1 %v645_v19  ;;  %v550_v19 = vadd.f32 %v1527_v28, %v549_v62  ;;  %v697_v39 = vmax.f32 %v611_v40, 0.0  ;;  %v677_v45 = vmax.f32 %v531_v59, 0.0 }
 0x13b   :  { %1072 = vmatprep.subr.mxu1 %v660_v10  ;;  %v699_v10 = vmax.f32 %v619_v32, 0.0 }
 0x13c   :  { %1073 = vmatpush3.msra.mxu1 %v644_v53  ;;  %v547_v53 = vadd.f32 %v1527_v28, %v546_v16  ;;  %v692_v16 = vmax.f32 %v590_v54, 0.0 }
 0x13d   :  { %1074 = vmatprep.subr.mxu1 %v659_v38  ;;  %v682_v38 = vmax.f32 %v550_v19, 0.0 }
 0x13e   :  { %1075 = vmatpush3.msra.mxu1 %v643_v51  ;;  %v681_v51 = vmax.f32 %v547_v53, 0.0 }
 0x13f   :  { %1076 = vmatprep.subr.mxu1 %v658_v42  ;;  %v680_v42 = vmax.f32 %v542_v43, 0.0 }
 0x140   :  { %1077 = vmatpush3.msra.mxu1 %v642_v21  ;;  %v679_v21 = vmax.f32 %v539_v6, 0.0 }
 0x141   :  { %1078 = vmatprep.subr.mxu1 %v657_v61  ;;  %v587_v61 = vadd.f32 %v1498_v8, %v1527_v28  ;;  %v579_v8 = vadd.f32 %v1527_v28, %v1504_v11  ;;  %v1270_v11 = vld [vmem:[%s1681_s4 + $0x8] sm:$0xff]   ;;  %v1271_v28 = vld [vmem:[%s1681_s4] sm:$0xff]   ;;  %s1301_s4 = smov [#allocation2]  }
 0x142   :  { %1079 = vmatpush3.msra.mxu1 %v641_v48  ;;  %v676_v48 = vmax.f32 %v526_v44, 0.0  ;;  %s955_s9 = sshll.u32 %s1301_s4, 4  ;;  %s956_s9 = int_to_ptr.vmem [resolvable:$true] %s955_s9 }
 0x143   :  { %1083 = vmatprep.subr.mxu1 %v704_v49  ;;  %793 = vmatmul.mubr.f32.vlgmr.msra.gmra.mxu1 %v1460_v47  ;;  %v701_v47 = vmax.f32 %v627_v27, 0.0  ;;  %v691_v52 = vmax.f32 %v587_v61, 0.0  ;;  %v690_v49 = vmax.f32 %v582_v14, 0.0  ;;  %v689_v17 = vmax.f32 %v579_v8, 0.0  ;;  %s1276_s5 = scalar_lea.vmem %s956_s9, 32  ;;  %p1281_p1 = scmp.lt.s32.totalorder %s956_s9, %s956_s9 }
 0x144   :  { %1084 = vmatpush3.msra.mxu1 %v688_v2  ;;  %862 = vmatprep.mubr.f32.mxu1 %v723_v57  ;;  %v675_v57 = vmax.f32 %v523_v9, 0.0  ;;  %v673_v2 = vmax.f32 %v515_v41, 0.0  ;;  %p1277_p0 = scmp.ne.s32.totalorder %s956_s9, %s1276_s5  ;;  %p1282_p2 = scmp.lt.s32.totalorder %s1276_s5, %s1276_s5 }
 0x145   :  { %1085 = vmatprep.subr.mxu1 %v703_v13 }
 0x146   :  { %1086 = vmatpush3.msra.mxu1 %v687_v55  ;;  %p1283_p3 = por %p1282_p2, %p1281_p1 }
 0x147   :  { %1087 = vmatprep.subr.mxu1 %v702_v30 }
 0x148   :  { %1088 = vmatpush3.msra.mxu1 %v686_v5  ;;  %p1284_p4 = pnand %p1283_p3, %p1277_p0 }
 0x149   :  { %1089 = vmatprep.subr.mxu1 %v701_v47 }
 0x14a   :  { %1090 = vmatpush3.msra.mxu1 %v685_v15 }
 0x14b   :  { %1091 = vmatprep.subr.mxu1 %v700_v33 }
 0x14c   :  { %1092 = vmatpush3.msra.mxu1 %v684_v56 }
 0x14d   :  { %1093 = vmatprep.subr.mxu1 %v699_v10 }
 0x14e   :  { %1094 = vmatpush3.msra.mxu1 %v683_v36 }
 0x14f   :  { %1095 = vmatprep.subr.mxu1 %v698_v7 }
 0x150   :  { %1096 = vmatpush3.msra.mxu1 %v682_v38 }
 0x151   :  { %1097 = vmatprep.subr.mxu1 %v697_v39 }
 0x152   :  { %1098 = vmatpush3.msra.mxu1 %v681_v51 }
 0x153   :  { %1099 = vmatprep.subr.mxu1 %v696_v0 }
 0x154   :  { %1100 = vmatpush3.msra.mxu1 %v680_v42 }
 0x155   :  { %1101 = vmatprep.subr.mxu1 %v695_v12 }
 0x156   :  { %1102 = vmatpush3.msra.mxu1 %v679_v21 }
 0x157   :  { %1103 = vmatprep.subr.mxu1 %v694_v31 }
 0x158   :  { %1104 = vmatpush3.msra.mxu1 %v678_v34 }
 0x159   :  { %1105 = vmatprep.subr.mxu1 %v693_v23 }
 0x15a   :  { %1106 = vmatpush3.msra.mxu1 %v677_v45 }
 0x15b   :  { %1107 = vmatprep.subr.mxu1 %v692_v16 }
 0x15c   :  { %1108 = vmatpush3.msra.mxu1 %v676_v48 }
 0x15d   :  { %1109 = vmatprep.subr.mxu1 %v691_v52 }
 0x15e   :  { %1110 = vmatpush3.msra.mxu1 %v675_v57 }
 0x15f   :  { %1111 = vmatprep.subr.mxu1 %v690_v49 }
 0x160   :  { %1112 = vmatpush3.msra.mxu1 %v674_v1 }
 0x161   :  { %1113 = vmatprep.subr.mxu1 %v689_v17 }
 0x162   :  { %1114 = vmatpush3.msra.mxu1 %v673_v2 }
 0x163   :  { %863 = vmatmul.mubr.f32.vlgmr.msra.gmra.mxu1 %v1464_v50  ;;  %1201 = vmatprep.subr.bf16.mxu1 %v1299_v22 }
 0x164   :  { %1202 = vmatpush3.bf16.msra.mxu1 %v1270_v11  ;;  %1205 = vmatprep.mubr.msk.bf16.mxu1 %vm1300_vm0, %v1299_v22 }
 0x165   :  { %1203 = vmatprep.subr.bf16.mxu1 %v1299_v22 }
 0x168   :  { %1204 = vmatpush3.bf16.msra.mxu1 %v1271_v28 }
 0x203   :  { %v1080_v46 = vpop.f32.mrf.mxu1 }
 0x205   :  { %v1081_v4 = vpop.f32.mrf.mxu1 }
 0x206   :  { %v1082_v50 = vadd.f32 %v1081_v4, %v1080_v46 }
 0x223   :  { %v1115_v13 = vpop.f32.mrf.mxu1 }
 0x225   :  { %v1116_v27 = vpop.f32.mrf.mxu1 }
 0x226   :  { %v1117_v60 = vadd.f32 %v1116_v27, %v1115_v13 }
 0x228   :  { %v865_v55 = vadd.f32 %v1117_v60, %v1082_v50 }
 0x22a   :  { %v868_v3 = vpack.c.bf16 %v865_v55, %v865_v55 }
 0x22c   :  { %1206 = vmatmul.mubr.msk.bf16.vlgmr.msra.gmra.mxu1 %vm892_vm1, %v868_v3 }
 0x2ec   :  { %v930_v30 = vpop.f32.mrf.mxu1 }
 0x2ed   :  { %v931_v5 = vadd.f32 %v1004_v18, %v930_v30 }
 0x2ee   :  { %v1207_v58 = vpop.f32.mrf.mxu1 }
 0x2ef   :  { %v937_v32 = vsel %vm936_vm2, %v931_v5, -inf }
 0x2f0   :  { %938 = vmax.xlane.f32.xlu0 %v937_v32  ;;  %v933_v47 = vpop.f32.mrf.mxu1 }
 0x2f2   :  { %v1208_v62 = vpop.f32.mrf.mxu1 }
 0x379   :  { %v939_v15 = vpop.xlane.xlu0 %938 }
 0x37a   :  { %v940_v63 = vsub.f32 %v931_v5, %v939_v15 }
 0x37c   :  { %v941_v33 = vmul.f32 1.442695, %v940_v63 }
 0x37e   :  { %1272 = vpow2.f32 %v941_v33 }
 0x38b   :  { %v1273_v35 = vpop.eup %1272 }
 0x38c   :  { %v943_v56 = vsel %vm936_vm2, %v1273_v35, 0.0 }
 0x38d   :  { %944 = vadd.xlane.f32.xlu0 %v943_v56 }
 0x416   :  { %v945_v19 = vpop.xlane.xlu0 %944 }
 0x417   :  { %1274 = vrcp.f32 %v945_v19 }
 0x424   :  { %v1275_v10 = vpop.eup %1274 }
 0x425   :  { %v947_v40 = vmul.f32 %v1275_v10, %v1273_v35 }
 0x427   :  { %948 = vst [vmem:[#allocation2] sm:$0x3] %v947_v40 }
 0x428   :  { %1287 = shalt.err (!%p1284_p4)
}
 0x429   :  { %958 = dma.vmem_to_hbm [thread:$0]  %s956_s9, 32, %s1683_s6, [#allocation3]  }
 0x42a   :  { %1296 = dma.done.wait [#allocation3], 32  }
 0x42b   :  { %1297 = vsyncadd [#allocation3], 4294967264 }
 0x42c   :  { %962 = vsyncpa [#allocation3], 1 }

</bundles_post_ra>
